<compile_context>
chip_gen: v7x
topology: tpu7x:2x2x1
jax: 0.10.0
libtpu: 0.0.40
codegen_flags: <defaults>
</compile_context>

<pallas_src>
import jax
import jax.numpy as jnp
from jax import lax
from jax.experimental import pallas as pl
from jax.experimental.pallas import tpu as pltpu


def _round_up(x, m):
    return ((x + m - 1) // m) * m


def _vmem_limit_bytes():
    # Generation-aware VMEM budget: ~3/4 of physical VMEM (128 MiB on v5e/v6e,
    # 64 MiB on v7x). Conservative fallback fits every generation.
    try:
        info = pltpu.get_tpu_info()
        cap = int(getattr(info, "vmem_capacity_bytes", 0) or 0)
        if cap > 0:
            return min((cap * 3) // 4, 100 * 1024 * 1024)
    except Exception:
        pass
    return 48 * 1024 * 1024


def _split_parallel_tile(dim, tile, align):
    # Ensure >= 2 blocks along a "parallel" grid axis when the dimension allows,
    # so both v7x TensorCores (megacore) receive work.
    if dim >= 2 * align and pl.cdiv(dim, tile) < 2:
        tile = max(align, _round_up(pl.cdiv(dim, 2), align))
    return tile


# ---------------------------------------------------------------------------
# Fast path: nn.Linear(1, 1)  ->  y = x * w + b
# Pure VPU fma on sublane-dense (row_block, 128) tiles; w, b live in SMEM.
# ---------------------------------------------------------------------------
def _linear_1x1_kernel(w_ref, b_ref, x_ref, o_ref):
    # w_ref, b_ref: (1,) f32 in SMEM. x_ref / o_ref: (row_block, 128) f32 in VMEM.
    o_ref[...] = x_ref[...] * w_ref[0] + b_ref[0]


def _linear_1x1_forward(x, weight, bias, *, row_block=1024):
    n = x.shape[0]
    n_pad = _round_up(n, 128)
    rows = n_pad // 128

    # Sublane-dense layout: batch fills both the 128-lane axis and the sublanes.
    x_flat = x.reshape(-1)
    if n_pad != n:
        x_flat = jnp.pad(x_flat, (0, n_pad - n))
    x2d = x_flat.reshape(rows, 128)

    row_block = min(row_block, _round_up(rows, 8))
    row_block = _split_parallel_tile(rows, row_block, 8)
    grid = (pl.cdiv(rows, row_block),)

    out2d = pl.pallas_call(
        _linear_1x1_kernel,
        out_shape=jax.ShapeDtypeStruct((rows, 128), x.dtype),
        grid=grid,
        in_specs=[
            pl.BlockSpec(memory_space=pltpu.MemorySpace.SMEM),   # weight scalar
            pl.BlockSpec(memory_space=pltpu.MemorySpace.SMEM),   # bias scalar
            pl.BlockSpec((row_block, 128), lambda i: (i, 0)),    # x slab
        ],
        out_specs=pl.BlockSpec((row_block, 128), lambda i: (i, 0)),
        compiler_params=pltpu.CompilerParams(
            dimension_semantics=("parallel",),
            vmem_limit_bytes=_vmem_limit_bytes(),
        ),
    )(weight.reshape(1), bias.reshape(1), x2d)

    return out2d.reshape(-1)[:n].reshape(n, 1)


# ---------------------------------------------------------------------------
# General path: tiled matmul, f32 VMEM accumulator, K innermost ("arbitrary").
# Weight is kept as (N, K): the contraction contracts dim 1 of both operands,
# so no wrapper-side transpose / HBM round trip of the weight is needed.
# ---------------------------------------------------------------------------
def _linear_tiled_kernel(x_ref, w_ref, b_ref, o_ref, acc_ref):
    @pl.when(pl.program_id(2) == 0)
    def _():
        acc_ref[...] = jnp.zeros_like(acc_ref)

    acc_ref[...] += lax.dot_general(
        x_ref[...],                      # (tm, tk)
        w_ref[...],                      # (tn, tk)
        dimension_numbers=(((1,), (1,)), ((), ())),
        preferred_element_type=jnp.float32,
    )

    @pl.when(pl.program_id(2) == pl.num_programs(2) - 1)
    def _():
        o_ref[...] = (acc_ref[...] + b_ref[...]).astype(o_ref.dtype)


def _linear_tiled_forward(x, weight, bias, *, tm=512, tn=512, tk=1024):
    m, k = x.shape
    n = weight.shape[0]

    # Clamp tiles to the problem with (8, 128) alignment; defaults are 256-aligned
    # (matches the 2x256x256 MXU on v6e/v7x) and sized well under every VMEM budget.
    tm = min(tm, _round_up(m, 8))
    tn = min(tn, _round_up(n, 128))
    tk = min(tk, _round_up(k, 128))
    tm = _split_parallel_tile(m, tm, 8)   # keep both v7x TensorCores busy

    # Only K is zero-padded (garbage in the K tail would corrupt valid outputs).
    # Partial M/N boundary blocks are handled by the grid; out-of-bounds rows/cols
    # are never written back, so no wrapper-side M/N padding / HBM copies.
    k_pad = _round_up(k, tk)
    x_in = x if k_pad == k else jnp.pad(x, ((0, 0), (0, k_pad - k)))
    w_in = weight if k_pad == k else jnp.pad(weight, ((0, 0), (0, k_pad - k)))
    b_in = bias.reshape(1, n)

    grid = (pl.cdiv(m, tm), pl.cdiv(n, tn), k_pad // tk)

    return pl.pallas_call(
        _linear_tiled_kernel,
        out_shape=jax.ShapeDtypeStruct((m, n), x.dtype),
        grid=grid,
        in_specs=[
            pl.BlockSpec((tm, tk), lambda i, j, kk: (i, kk)),   # x    (M, K)
            pl.BlockSpec((tn, tk), lambda i, j, kk: (j, kk)),   # W    (N, K)
            pl.BlockSpec((1, tn), lambda i, j, kk: (0, j)),     # bias (1, N)
        ],
        out_specs=pl.BlockSpec((tm, tn), lambda i, j, kk: (i, j)),
        scratch_shapes=[pltpu.VMEM((tm, tn), jnp.float32)],
        compiler_params=pltpu.CompilerParams(
            dimension_semantics=("parallel", "parallel", "arbitrary"),
            vmem_limit_bytes=_vmem_limit_bytes(),
        ),
    )(x_in, w_in, b_in)


def linear_forward(x, weight, bias):
    """PyTorch nn.Linear forward: y = x @ W^T + b.

    x: (N, D_in) f32, weight: (D_out, D_in) f32, bias: (D_out,) f32 -> (N, D_out) f32.
    """
    d_out, d_in = weight.shape
    if d_in == 1 and d_out == 1:
        return _linear_1x1_forward(x, weight, bias)
    return _linear_tiled_forward(x, weight, bias)


if __name__ == "__main__":
    input_dim = 1
    output_dim = 1
    batch = 8

    key = jax.random.PRNGKey(0)
    kx, kw, kb, kx2, kw2, kb2, kx3 = jax.random.split(key, 7)

    # PyTorch-like init for nn.Linear(1, 1): U(-1/sqrt(D_in), 1/sqrt(D_in)).
    bound = 1.0 / (input_dim ** 0.5)
    weight = jax.random.uniform(kw, (output_dim, input_dim), jnp.float32, -bound, bound)
    bias = jax.random.uniform(kb, (output_dim,), jnp.float32, -bound, bound)
    x = jax.random.normal(kx, (batch, input_dim), dtype=jnp.float32)

    out = jax.block_until_ready(linear_forward(x, weight, bias))
    ref = x @ weight.T + bias
    assert out.shape == (batch, output_dim)
    assert jnp.allclose(out, ref, atol=1e-5), "mismatch vs reference (1x1 path)"

    # 1x1 path with a batch that is not a multiple of 128 (exercise pad + slice).
    x3 = jax.random.normal(kx3, (260, input_dim), dtype=jnp.float32)
    out3 = jax.block_until_ready(linear_forward(x3, weight, bias))
    ref3 = x3 @ weight.T + bias
    assert out3.shape == (260, output_dim)
    assert jnp.allclose(out3, ref3, atol=1e-5), "mismatch vs reference (1x1 ragged)"

    # Sanity-check the general tiled path (larger Linear than the spec module),
    # including partial M/N blocks and K zero-padding.
    d_in2, d_out2 = 32, 16
    bound2 = 1.0 / (d_in2 ** 0.5)
    w2 = jax.random.uniform(kw2, (d_out2, d_in2), jnp.float32, -bound2, bound2)
    b2 = jax.random.uniform(kb2, (d_out2,), jnp.float32, -bound2, bound2)
    x2 = jax.random.normal(kx2, (batch, d_in2), dtype=jnp.float32)

    out2 = jax.block_until_ready(linear_forward(x2, w2, b2))
    ref2 = x2 @ w2.T + b2
    assert out2.shape == (batch, d_out2)
    assert jnp.allclose(out2, ref2, atol=1e-4), "mismatch vs reference (tiled path)"

    print("KERNEL_OK")
</pallas_src>

<mosaic_0001>
module attributes {stable_mosaic.version = 11 : i64} {
  func.func @_linear_1x1_kernel(%arg0: i32, %arg1: memref<1xf32, #tpu.memory_space<smem>>, %arg2: memref<1xf32, #tpu.memory_space<smem>>, %arg3: memref<8x128xf32, #tpu.memory_space<vmem>>, %arg4: memref<8x128xf32, #tpu.memory_space<vmem>>) attributes {dimension_semantics = [#tpu.dimension_semantics<parallel>], iteration_bounds = array<i64: 1>, scalar_prefetch = 0 : i64, scratch_operands = 0 : i64, tpu.core_type = #tpu.core_type<tc>, window_params = [{transform_indices = @transform_0, window_bounds = array<i64: 1>}, {transform_indices = @transform_1, window_bounds = array<i64: 1>}, {transform_indices = @transform_2, window_bounds = array<i64: 8, 128>}, {transform_indices = @transform_3, window_bounds = array<i64: 8, 128>}]} {
    %c0 = arith.constant 0 : index
    %c0_0 = arith.constant 0 : index
    %0 = vector.load %arg3[%c0, %c0_0] : memref<8x128xf32, #tpu.memory_space<vmem>>, vector<8x128xf32>
    %c0_1 = arith.constant 0 : index
    %1 = memref.load %arg1[%c0_1] : memref<1xf32, #tpu.memory_space<smem>>
    %2 = vector.broadcast %1 : f32 to vector<8x128xf32>
    %3 = arith.mulf %0, %2 : vector<8x128xf32>
    %c0_2 = arith.constant 0 : index
    %4 = memref.load %arg2[%c0_2] : memref<1xf32, #tpu.memory_space<smem>>
    %5 = vector.broadcast %4 : f32 to vector<8x128xf32>
    %6 = arith.addf %3, %5 : vector<8x128xf32>
    %c0_3 = arith.constant 0 : index
    %c0_4 = arith.constant 0 : index
    %7 = vector.load %arg4[%c0_3, %c0_4] : memref<8x128xf32, #tpu.memory_space<vmem>>, vector<8x128xf32>
    tpu.vector_store %arg4[%c0_3, %c0_4], %6 {strides = array<i32>} : memref<8x128xf32, #tpu.memory_space<vmem>>, vector<8x128xf32>,
    return
  }
  func.func @transform_0(%arg0: i32) -> i32 {
    %c0_i32 = arith.constant 0 : i32
    %c0_i32_0 = arith.constant 0 : i32
    return %c0_i32 : i32
  }
  func.func @transform_1(%arg0: i32) -> i32 {
    %c0_i32 = arith.constant 0 : i32
    %c0_i32_0 = arith.constant 0 : i32
    return %c0_i32 : i32
  }
  func.func @transform_2(%arg0: i32) -> (i32, i32) {
    %c0_i32 = arith.constant 0 : i32
    %c0_i32_0 = arith.constant 0 : i32
    return %arg0, %c0_i32 : i32, i32
  }
  func.func @transform_3(%arg0: i32) -> (i32, i32) {
    %c0_i32 = arith.constant 0 : i32
    %c0_i32_0 = arith.constant 0 : i32
    return %arg0, %c0_i32 : i32, i32
  }
}

</mosaic_0001>

<bundles_post_ra>
// kernel: tpu_custom_call.1
= control target key start
LH: loop header
LB: loop body
LE: loop exit
PB: predicated region body
PF: predicated region fallthrough
CT: control target
= control target key end

     0   :  { %10 = vsyncpa [#allocation5], 0  ;;  %s112_s0 = inlined_call_operand.<no memory space> [shape: f32[1], index: 0, kind: input, shape index: {}]   ;;  %s113_s1 = inlined_call_operand.<no memory space> [shape: f32[1], index: 1, kind: input, shape index: {}]   ;;  %s114_s2 = inlined_call_operand.vmem [shape: f32[1,128], index: 2, kind: input, shape index: {}]   ;;  %s115_s3 = inlined_call_operand.hbm [shape: f32[1,128], index: 3, kind: output, shape index: {}]  }
   0x1   :  { %v17_v0 = vld [vmem:[%s114_s2] sm:$0xff]  ;;  %v19_v1 = vstv %s112_s0  ;;  %v22_v2 = vstv %s113_s1 }
   0x2   :  { %v20_v3 = vmul.f32 %v19_v1, %v17_v0 }
   0x4   :  { %v23_v4 = vadd.f32 %v22_v2, %v20_v3 }
   0x6   :  { %24 = vst [vmem:[#allocation4] sm:$0xff] %v23_v4 }
   0x7   :  { %29 = vsyncadd [#allocation5], 112  ;;  %s68_s18 = smov [#allocation4]  }
   0x8   :  { %s30_s19 = sshll.u32 %s68_s18, 4  ;;  %s31_s19 = int_to_ptr.vmem [resolvable:$true] %s30_s19 }
   0x9   :  { %s44_s20 = scalar_lea.vmem %s31_s19, 16  ;;  %s48_s21 = scalar_lea.vmem %s31_s19, 128 }
   0xa   :  { %p45_p0 = scmp.ne.s32.totalorder %s31_s19, %s44_s20  ;;  %p49_p1 = scmp.lt.s32.totalorder %s31_s19, %s31_s19 }
   0xb   :  { %p50_p2 = scmp.lt.s32.totalorder %s48_s21, %s44_s20 }
   0xd   :  { %p51_p3 = por %p50_p2, %p49_p1 }
   0xf   :  { %p52_p4 = pnand %p51_p3, %p45_p0 }
  0x11   :  { %55 = shalt.err (!%p52_p4)
}
  0x12   :  { %s56_s22 = scalar_lea.hbm %s115_s3, 16 }
  0x13   :  { %p57_p5 = scmp.ne.s32.totalorder %s115_s3, %s56_s22  ;;  %p60_p6 = scmp.lt.u32.totalorder %s56_s22, %s115_s3 }
  0x15   :  { %p62_p7 = pnand %p60_p6, %p57_p5 }
  0x17   :  { %65 = shalt.err (!%p62_p7)
}
  0x18   :  { %s69_s26 = smov 16   ;;  %s70_s27 = smov 1  }
  0x19   :  { %36 = dma.vmem_to_hbm [thread:$0]  %s31_s19, 16, %s115_s3, [#allocation5], %s69_s26, %s69_s26, %s70_s27  }
  0x1a   :  { %66 = dma.done.wait [#allocation5], 128  }
  0x1b   :  { %67 = vsyncadd [#allocation5], 4294967168 }
  0x1c   :  { %40 = vsyncpa [#allocation5], 1 }

</bundles_post_ra>
